<compile_context>
chip_gen: v5e
topology: v5e:2x2
jax: 0.10.0
libtpu: 0.0.40
codegen_flags: <defaults>
</compile_context>

<pallas_src>
import jax
import jax.numpy as jnp
from jax.experimental import pallas as pl
from jax.experimental.pallas import tpu as pltpu

_GATHER_WAVE = 8  # outstanding row-gather DMAs per wave (== DMA sem count)


def _gather_tile(tok_ref, emb_hbm, x0_vmem, sems):
    """DMA-gather tile_n embedding rows (f32) from HBM into VMEM scratch.

    Rows are gathered in f32 so each per-row DMA is a 32-bit-aligned
    contiguous copy (single-row bf16 scatter into packed sublanes would be a
    strided sub-word DMA); operands are downcast in-register for the MXU.
    """
    tile_n = x0_vmem.shape[0]            # static
    base = pl.program_id(0) * tile_n
    n_waves = tile_n // _GATHER_WAVE     # tile_n is a multiple of 8

    @pl.loop(0, n_waves)
    def _(w):
        r0 = pl.multiple_of(w * _GATHER_WAVE, _GATHER_WAVE)
        for j in range(_GATHER_WAVE):    # static unroll within a wave
            tok = tok_ref[base + r0 + j]
            pltpu.make_async_copy(emb_hbm.at[tok], x0_vmem.at[r0 + j],
                                  sems.at[j]).start()
        for j in range(_GATHER_WAVE):
            pltpu.make_async_copy(emb_hbm.at[0], x0_vmem.at[r0 + j],
                                  sems.at[j]).wait()


def _avg_kernel(tok_ref, emb_hbm,
                w_ph_ref, b_ph_ref, w_s1_ref, w_s2_ref, b_avg_ref,
                avg_ref, x0_vmem, sems):
    """Fast path: fused gather + 3 matmuls, emits only the averaged embedding."""
    _gather_tile(tok_ref, emb_hbm, x0_vmem, sems)
    x0_f32 = x0_vmem[...]                               # [tile_n, D] f32
    x0 = x0_f32.astype(w_ph_ref.dtype)                  # bf16 MXU operands
    o1 = jnp.dot(x0, w_ph_ref[...],
                 preferred_element_type=jnp.float32) + b_ph_ref[...]
    o2n = jnp.dot(x0, w_s1_ref[...], preferred_element_type=jnp.float32)
    o3n = jnp.dot(o1.astype(w_s2_ref.dtype), w_s2_ref[...],
                  preferred_element_type=jnp.float32)
    # avg = 0.5*(o2 + o3) with biases folded into b_avg = 0.5*(b_s1 + b_s2).
    avg_ref[...] = 0.5 * (o2n + o3n) + b_avg_ref[...]


def _full_kernel(tok_ref, emb_hbm,
                 w_ph_ref, b_ph_ref, w_s1_ref, b_s1_ref, w_s2_ref, b_s2_ref,
                 x0_ref, o1_ref, o2_ref, o3_ref, avg_ref, x0_vmem, sems):
    """Full path: emits all five module outputs."""
    _gather_tile(tok_ref, emb_hbm, x0_vmem, sems)
    x0_f32 = x0_vmem[...]
    x0 = x0_f32.astype(w_ph_ref.dtype)
    o1 = jnp.dot(x0, w_ph_ref[...],
                 preferred_element_type=jnp.float32) + b_ph_ref[...]
    o2 = jnp.dot(x0, w_s1_ref[...],
                 preferred_element_type=jnp.float32) + b_s1_ref[...]
    o3 = jnp.dot(o1.astype(w_s2_ref.dtype), w_s2_ref[...],
                 preferred_element_type=jnp.float32) + b_s2_ref[...]
    x0_ref[...] = x0_f32
    o1_ref[...] = o1
    o2_ref[...] = o2
    o3_ref[...] = o3
    avg_ref[...] = 0.5 * (o2 + o3)


def _round_up(x, m):
    return (x + m - 1) // m * m


def averaging_phonetic_space_word_embedding(
        token_ids, emb_table, w_ph, b_ph, w_s1, b_s1, w_s2, b_s2,
        *, compute_dtype=jnp.bfloat16, return_intermediates=False,
        tile_n=None):
    """Fused forward pass.

    token_ids: [B, S] int32; emb_table: [V, D]; weights pre-transposed [D, D];
    biases [D] or [1, D].  Returns avg [B, S, D] (default) or the full
    [x0, o1, o2, o3, avg] list when return_intermediates=True.
    """
    B, S = token_ids.shape
    V, D = emb_table.shape
    N = B * S

    if tile_n is None:
        tile_n = min(256, _round_up(N, 8))
    tile_n = _round_up(tile_n, _GATHER_WAVE)
    Np = _round_up(N, tile_n)
    num_tiles = Np // tile_n

    tok = token_ids.reshape(-1).astype(jnp.int32)
    if Np != N:
        tok = jnp.pad(tok, (0, Np - N))         # padded rows gather token 0

    emb_f32 = emb_table.astype(jnp.float32)     # gathered rows stay f32
    wph = w_ph.astype(compute_dtype)
    ws1 = w_s1.astype(compute_dtype)
    ws2 = w_s2.astype(compute_dtype)
    bph = b_ph.reshape(1, D).astype(jnp.float32)
    bs1 = b_s1.reshape(1, D).astype(jnp.float32)
    bs2 = b_s2.reshape(1, D).astype(jnp.float32)

    emb_spec = pl.BlockSpec(memory_space=pl.ANY)              # raw HBM ref
    w_spec = pl.BlockSpec((D, D), lambda i, tok: (0, 0))      # resident weights
    b_spec = pl.BlockSpec((1, D), lambda i, tok: (0, 0))      # resident biases
    row_spec = pl.BlockSpec((tile_n, D), lambda i, tok: (i, 0))
    scratch = [pltpu.VMEM((tile_n, D), jnp.float32),          # gathered x0 tile
               pltpu.SemaphoreType.DMA((_GATHER_WAVE,))]
    cparams = pltpu.CompilerParams(
        dimension_semantics=("parallel",),        # shard row tiles across TCs
        vmem_limit_bytes=32 * 1024 * 1024)

    if not return_intermediates:
        b_avg = 0.5 * (bs1 + bs2)
        avg = pl.pallas_call(
            _avg_kernel,
            out_shape=jax.ShapeDtypeStruct((Np, D), jnp.float32),
            grid_spec=pltpu.PrefetchScalarGridSpec(
                num_scalar_prefetch=1,
                grid=(num_tiles,),
                in_specs=[emb_spec, w_spec, b_spec, w_spec, w_spec, b_spec],
                out_specs=row_spec,
                scratch_shapes=scratch),
            compiler_params=cparams,
        )(tok, emb_f32, wph, bph, ws1, ws2, b_avg)
        return avg[:N].reshape(B, S, D)

    outs = pl.pallas_call(
        _full_kernel,
        out_shape=[jax.ShapeDtypeStruct((Np, D), jnp.float32)] * 5,
        grid_spec=pltpu.PrefetchScalarGridSpec(
            num_scalar_prefetch=1,
            grid=(num_tiles,),
            in_specs=[emb_spec, w_spec, b_spec, w_spec, b_spec, w_spec, b_spec],
            out_specs=[row_spec] * 5,
            scratch_shapes=scratch),
        compiler_params=cparams,
    )(tok, emb_f32, wph, bph, ws1, bs1, ws2, bs2)
    return [o[:N].reshape(B, S, D) for o in outs]


if __name__ == "__main__":
    B, S, V, D = 2, 8, 64, 128

    key = jax.random.PRNGKey(0)
    ks = jax.random.split(key, 8)
    token_ids = jax.random.randint(ks[0], (B, S), 0, V, dtype=jnp.int32)
    emb_table = jax.random.normal(ks[1], (V, D), jnp.float32) * 0.05

    scale = 1.0 / jnp.sqrt(jnp.float32(D))
    w_ph = jax.random.normal(ks[2], (D, D), jnp.float32) * scale
    w_s1 = jax.random.normal(ks[3], (D, D), jnp.float32) * scale
    w_s2 = jax.random.normal(ks[4], (D, D), jnp.float32) * scale
    b_ph = jax.random.normal(ks[5], (D,), jnp.float32) * 0.01
    b_s1 = jax.random.normal(ks[6], (D,), jnp.float32) * 0.01
    b_s2 = jax.random.normal(ks[7], (D,), jnp.float32) * 0.01

    # Fast path (bf16 MXU operands, avg-only output).
    avg = averaging_phonetic_space_word_embedding(
        token_ids, emb_table, w_ph, b_ph, w_s1, b_s1, w_s2, b_s2)
    avg = jax.block_until_ready(avg)

    # Full path (all five module outputs, bf16 MXU operands).
    outs = averaging_phonetic_space_word_embedding(
        token_ids, emb_table, w_ph, b_ph, w_s1, b_s1, w_s2, b_s2,
        return_intermediates=True)
    outs = jax.block_until_ready(outs)

    # Exact-f32 path (parity with the PyTorch f32 module).
    avg_f32 = averaging_phonetic_space_word_embedding(
        token_ids, emb_table, w_ph, b_ph, w_s1, b_s1, w_s2, b_s2,
        compute_dtype=jnp.float32)
    avg_f32 = jax.block_until_ready(avg_f32)

    # ---- references ----
    x0 = jnp.take(emb_table, token_ids.reshape(-1), axis=0)

    # bf16-operand reference (mirrors kernel casts; f32 accumulation).
    cd = jnp.bfloat16
    x0c = x0.astype(cd).astype(jnp.float32)
    wphc = w_ph.astype(cd).astype(jnp.float32)
    ws1c = w_s1.astype(cd).astype(jnp.float32)
    ws2c = w_s2.astype(cd).astype(jnp.float32)
    r1 = x0c @ wphc + b_ph
    r2 = x0c @ ws1c + b_s1
    r3 = r1.astype(cd).astype(jnp.float32) @ ws2c + b_s2
    r_avg = 0.5 * (r2 + r3)
    refs = [x0, r1, r2, r3, r_avg]

    assert jnp.allclose(avg.reshape(-1, D), r_avg, atol=1e-3, rtol=1e-2), "avg mismatch"
    for got, ref in zip(outs, refs):
        assert jnp.allclose(got.reshape(-1, D), ref, atol=1e-3, rtol=1e-2), "full-path mismatch"

    # Pure f32 reference for the exact path.
    f1 = x0 @ w_ph + b_ph
    f2 = x0 @ w_s1 + b_s1
    f3 = f1 @ w_s2 + b_s2
    f_avg = 0.5 * (f2 + f3)
    assert jnp.allclose(avg_f32.reshape(-1, D), f_avg, atol=1e-4, rtol=1e-4), "f32 parity mismatch"

    print("KERNEL_OK")
</pallas_src>

<mosaic_0001>
module attributes {stable_mosaic.version = 11 : i64} {
  func.func @_avg_kernel(%arg0: i32, %arg1: memref<16xi32, #tpu.memory_space<smem>>, %arg2: memref<64x128xf32, #tpu.memory_space<any>>, %arg3: memref<128x128xbf16, #tpu.memory_space<vmem>>, %arg4: memref<1x128xf32, #tpu.memory_space<vmem>>, %arg5: memref<128x128xbf16, #tpu.memory_space<vmem>>, %arg6: memref<128x128xbf16, #tpu.memory_space<vmem>>, %arg7: memref<1x128xf32, #tpu.memory_space<vmem>>, %arg8: memref<16x128xf32, #tpu.memory_space<vmem>>, %arg9: memref<16x128xf32, #tpu.memory_space<vmem>>, %arg10: memref<8x!tpu.dma_semaphore, #tpu.memory_space<semaphore_mem>>) attributes {dimension_semantics = [#tpu.dimension_semantics<parallel>], iteration_bounds = array<i64: 1>, scalar_prefetch = 1 : i64, scratch_operands = 2 : i64, tpu.core_type = #tpu.core_type<tc>, window_params = [{}, {pipeline_mode = #tpu.pipeline_mode<synchronous>, transform_indices = @transform_1, window_bounds = array<i64: 128, 128>}, {pipeline_mode = #tpu.pipeline_mode<synchronous>, transform_indices = @transform_2, window_bounds = array<i64: 1, 128>}, {pipeline_mode = #tpu.pipeline_mode<synchronous>, transform_indices = @transform_3, window_bounds = array<i64: 128, 128>}, {pipeline_mode = #tpu.pipeline_mode<synchronous>, transform_indices = @transform_4, window_bounds = array<i64: 128, 128>}, {pipeline_mode = #tpu.pipeline_mode<synchronous>, transform_indices = @transform_5, window_bounds = array<i64: 1, 128>}, {transform_indices = @transform_6, window_bounds = array<i64: 16, 128>}]} {
    %c16_i32 = arith.constant 16 : i32
    %0 = arith.muli %arg0, %c16_i32 : i32
    %c0_i32 = arith.constant 0 : i32
    %c2_i32 = arith.constant 2 : i32
    %1 = arith.addi %c0_i32, %c2_i32 : i32
    %c1_i32 = arith.constant 1 : i32
    scf.for %arg11 = %c0_i32 to %1 step %c1_i32  : i32 {
      %c1_i32_17 = arith.constant 1 : i32
      %21 = arith.muli %arg11, %c1_i32_17 : i32
      %c0_i32_18 = arith.constant 0 : i32
      %22 = arith.addi %c0_i32_18, %21 : i32
      %c8_i32 = arith.constant 8 : i32
      %23 = arith.muli %22, %c8_i32 : i32
      %24 = tpu.assume_multiple %23, 8 : i32
      %25 = arith.addi %0, %24 : i32
      %c0_i32_19 = arith.constant 0 : i32
      %26 = arith.addi %25, %c0_i32_19 : i32
      %27 = arith.index_cast %26 : i32 to index
      %28 = memref.load %arg1[%27] : memref<16xi32, #tpu.memory_space<smem>>
      %c0_i32_20 = arith.constant 0 : i32
      %29 = arith.addi %24, %c0_i32_20 : i32
      %c0_i32_21 = arith.constant 0 : i32
      %c0_i32_22 = arith.constant 0 : i32
      %30 = tpu.memref_slice %arg2[%28, %c0_i32_22] : memref<64x128xf32, #tpu.memory_space<any>> -> memref<1x128xf32, #tpu.memory_space<any>>
      %31 = tpu.memref_squeeze %30 : memref<1x128xf32, #tpu.memory_space<any>> -> memref<128xf32, #tpu.memory_space<any>>
      %c0_i32_23 = arith.constant 0 : i32
      %32 = tpu.memref_slice %arg9[%29, %c0_i32_23] : memref<16x128xf32, #tpu.memory_space<vmem>> -> memref<1x128xf32, #tpu.memory_space<vmem>>
      %33 = tpu.memref_squeeze %32 : memref<1x128xf32, #tpu.memory_space<vmem>> -> memref<128xf32, #tpu.memory_space<vmem>>
      %34 = tpu.memref_slice %arg10[%c0_i32_21] : memref<8x!tpu.dma_semaphore, #tpu.memory_space<semaphore_mem>> -> memref<1x!tpu.dma_semaphore, #tpu.memory_space<semaphore_mem>>
      %35 = tpu.memref_squeeze %34 : memref<1x!tpu.dma_semaphore, #tpu.memory_space<semaphore_mem>> -> memref<!tpu.dma_semaphore, #tpu.memory_space<semaphore_mem>>
      tpu.enqueue_dma source(%31 : memref<128xf32, #tpu.memory_space<any>>) target(%33 : memref<128xf32, #tpu.memory_space<vmem>>) target_semaphore(%35 : memref<!tpu.dma_semaphore, #tpu.memory_space<semaphore_mem>>)
      %36 = arith.addi %0, %24 : i32
      %c1_i32_24 = arith.constant 1 : i32
      %37 = arith.addi %36, %c1_i32_24 : i32
      %38 = arith.index_cast %37 : i32 to index
      %39 = memref.load %arg1[%38] : memref<16xi32, #tpu.memory_space<smem>>
      %c1_i32_25 = arith.constant 1 : i32
      %40 = arith.addi %24, %c1_i32_25 : i32
      %c1_i32_26 = arith.constant 1 : i32
      %c0_i32_27 = arith.constant 0 : i32
      %41 = tpu.memref_slice %arg2[%39, %c0_i32_27] : memref<64x128xf32, #tpu.memory_space<any>> -> memref<1x128xf32, #tpu.memory_space<any>>
      %42 = tpu.memref_squeeze %41 : memref<1x128xf32, #tpu.memory_space<any>> -> memref<128xf32, #tpu.memory_space<any>>
      %c0_i32_28 = arith.constant 0 : i32
      %43 = tpu.memref_slice %arg9[%40, %c0_i32_28] : memref<16x128xf32, #tpu.memory_space<vmem>> -> memref<1x128xf32, #tpu.memory_space<vmem>>
      %44 = tpu.memref_squeeze %43 : memref<1x128xf32, #tpu.memory_space<vmem>> -> memref<128xf32, #tpu.memory_space<vmem>>
      %45 = tpu.memref_slice %arg10[%c1_i32_26] : memref<8x!tpu.dma_semaphore, #tpu.memory_space<semaphore_mem>> -> memref<1x!tpu.dma_semaphore, #tpu.memory_space<semaphore_mem>>
      %46 = tpu.memref_squeeze %45 : memref<1x!tpu.dma_semaphore, #tpu.memory_space<semaphore_mem>> -> memref<!tpu.dma_semaphore, #tpu.memory_space<semaphore_mem>>
      tpu.enqueue_dma source(%42 : memref<128xf32, #tpu.memory_space<any>>) target(%44 : memref<128xf32, #tpu.memory_space<vmem>>) target_semaphore(%46 : memref<!tpu.dma_semaphore, #tpu.memory_space<semaphore_mem>>)
      %47 = arith.addi %0, %24 : i32
      %c2_i32_29 = arith.constant 2 : i32
      %48 = arith.addi %47, %c2_i32_29 : i32
      %49 = arith.index_cast %48 : i32 to index
      %50 = memref.load %arg1[%49] : memref<16xi32, #tpu.memory_space<smem>>
      %c2_i32_30 = arith.constant 2 : i32
      %51 = arith.addi %24, %c2_i32_30 : i32
      %c2_i32_31 = arith.constant 2 : i32
      %c0_i32_32 = arith.constant 0 : i32
      %52 = tpu.memref_slice %arg2[%50, %c0_i32_32] : memref<64x128xf32, #tpu.memory_space<any>> -> memref<1x128xf32, #tpu.memory_space<any>>
      %53 = tpu.memref_squeeze %52 : memref<1x128xf32, #tpu.memory_space<any>> -> memref<128xf32, #tpu.memory_space<any>>
      %c0_i32_33 = arith.constant 0 : i32
      %54 = tpu.memref_slice %arg9[%51, %c0_i32_33] : memref<16x128xf32, #tpu.memory_space<vmem>> -> memref<1x128xf32, #tpu.memory_space<vmem>>
      %55 = tpu.memref_squeeze %54 : memref<1x128xf32, #tpu.memory_space<vmem>> -> memref<128xf32, #tpu.memory_space<vmem>>
      %56 = tpu.memref_slice %arg10[%c2_i32_31] : memref<8x!tpu.dma_semaphore, #tpu.memory_space<semaphore_mem>> -> memref<1x!tpu.dma_semaphore, #tpu.memory_space<semaphore_mem>>
      %57 = tpu.memref_squeeze %56 : memref<1x!tpu.dma_semaphore, #tpu.memory_space<semaphore_mem>> -> memref<!tpu.dma_semaphore, #tpu.memory_space<semaphore_mem>>
      tpu.enqueue_dma source(%53 : memref<128xf32, #tpu.memory_space<any>>) target(%55 : memref<128xf32, #tpu.memory_space<vmem>>) target_semaphore(%57 : memref<!tpu.dma_semaphore, #tpu.memory_space<semaphore_mem>>)
      %58 = arith.addi %0, %24 : i32
      %c3_i32 = arith.constant 3 : i32
      %59 = arith.addi %58, %c3_i32 : i32
      %60 = arith.index_cast %59 : i32 to index
      %61 = memref.load %arg1[%60] : memref<16xi32, #tpu.memory_space<smem>>
      %c3_i32_34 = arith.constant 3 : i32
      %62 = arith.addi %24, %c3_i32_34 : i32
      %c3_i32_35 = arith.constant 3 : i32
      %c0_i32_36 = arith.constant 0 : i32
      %63 = tpu.memref_slice %arg2[%61, %c0_i32_36] : memref<64x128xf32, #tpu.memory_space<any>> -> memref<1x128xf32, #tpu.memory_space<any>>
      %64 = tpu.memref_squeeze %63 : memref<1x128xf32, #tpu.memory_space<any>> -> memref<128xf32, #tpu.memory_space<any>>
      %c0_i32_37 = arith.constant 0 : i32
      %65 = tpu.memref_slice %arg9[%62, %c0_i32_37] : memref<16x128xf32, #tpu.memory_space<vmem>> -> memref<1x128xf32, #tpu.memory_space<vmem>>
      %66 = tpu.memref_squeeze %65 : memref<1x128xf32, #tpu.memory_space<vmem>> -> memref<128xf32, #tpu.memory_space<vmem>>
      %67 = tpu.memref_slice %arg10[%c3_i32_35] : memref<8x!tpu.dma_semaphore, #tpu.memory_space<semaphore_mem>> -> memref<1x!tpu.dma_semaphore, #tpu.memory_space<semaphore_mem>>
      %68 = tpu.memref_squeeze %67 : memref<1x!tpu.dma_semaphore, #tpu.memory_space<semaphore_mem>> -> memref<!tpu.dma_semaphore, #tpu.memory_space<semaphore_mem>>
      tpu.enqueue_dma source(%64 : memref<128xf32, #tpu.memory_space<any>>) target(%66 : memref<128xf32, #tpu.memory_space<vmem>>) target_semaphore(%68 : memref<!tpu.dma_semaphore, #tpu.memory_space<semaphore_mem>>)
      %69 = arith.addi %0, %24 : i32
      %c4_i32 = arith.constant 4 : i32
      %70 = arith.addi %69, %c4_i32 : i32
      %71 = arith.index_cast %70 : i32 to index
      %72 = memref.load %arg1[%71] : memref<16xi32, #tpu.memory_space<smem>>
      %c4_i32_38 = arith.constant 4 : i32
      %73 = arith.addi %24, %c4_i32_38 : i32
      %c4_i32_39 = arith.constant 4 : i32
      %c0_i32_40 = arith.constant 0 : i32
      %74 = tpu.memref_slice %arg2[%72, %c0_i32_40] : memref<64x128xf32, #tpu.memory_space<any>> -> memref<1x128xf32, #tpu.memory_space<any>>
      %75 = tpu.memref_squeeze %74 : memref<1x128xf32, #tpu.memory_space<any>> -> memref<128xf32, #tpu.memory_space<any>>
      %c0_i32_41 = arith.constant 0 : i32
      %76 = tpu.memref_slice %arg9[%73, %c0_i32_41] : memref<16x128xf32, #tpu.memory_space<vmem>> -> memref<1x128xf32, #tpu.memory_space<vmem>>
      %77 = tpu.memref_squeeze %76 : memref<1x128xf32, #tpu.memory_space<vmem>> -> memref<128xf32, #tpu.memory_space<vmem>>
      %78 = tpu.memref_slice %arg10[%c4_i32_39] : memref<8x!tpu.dma_semaphore, #tpu.memory_space<semaphore_mem>> -> memref<1x!tpu.dma_semaphore, #tpu.memory_space<semaphore_mem>>
      %79 = tpu.memref_squeeze %78 : memref<1x!tpu.dma_semaphore, #tpu.memory_space<semaphore_mem>> -> memref<!tpu.dma_semaphore, #tpu.memory_space<semaphore_mem>>
      tpu.enqueue_dma source(%75 : memref<128xf32, #tpu.memory_space<any>>) target(%77 : memref<128xf32, #tpu.memory_space<vmem>>) target_semaphore(%79 : memref<!tpu.dma_semaphore, #tpu.memory_space<semaphore_mem>>)
      %80 = arith.addi %0, %24 : i32
      %c5_i32 = arith.constant 5 : i32
      %81 = arith.addi %80, %c5_i32 : i32
      %82 = arith.index_cast %81 : i32 to index
      %83 = memref.load %arg1[%82] : memref<16xi32, #tpu.memory_space<smem>>
      %c5_i32_42 = arith.constant 5 : i32
      %84 = arith.addi %24, %c5_i32_42 : i32
      %c5_i32_43 = arith.constant 5 : i32
      %c0_i32_44 = arith.constant 0 : i32
      %85 = tpu.memref_slice %arg2[%83, %c0_i32_44] : memref<64x128xf32, #tpu.memory_space<any>> -> memref<1x128xf32, #tpu.memory_space<any>>
      %86 = tpu.memref_squeeze %85 : memref<1x128xf32, #tpu.memory_space<any>> -> memref<128xf32, #tpu.memory_space<any>>
      %c0_i32_45 = arith.constant 0 : i32
      %87 = tpu.memref_slice %arg9[%84, %c0_i32_45] : memref<16x128xf32, #tpu.memory_space<vmem>> -> memref<1x128xf32, #tpu.memory_space<vmem>>
      %88 = tpu.memref_squeeze %87 : memref<1x128xf32, #tpu.memory_space<vmem>> -> memref<128xf32, #tpu.memory_space<vmem>>
      %89 = tpu.memref_slice %arg10[%c5_i32_43] : memref<8x!tpu.dma_semaphore, #tpu.memory_space<semaphore_mem>> -> memref<1x!tpu.dma_semaphore, #tpu.memory_space<semaphore_mem>>
      %90 = tpu.memref_squeeze %89 : memref<1x!tpu.dma_semaphore, #tpu.memory_space<semaphore_mem>> -> memref<!tpu.dma_semaphore, #tpu.memory_space<semaphore_mem>>
      tpu.enqueue_dma source(%86 : memref<128xf32, #tpu.memory_space<any>>) target(%88 : memref<128xf32, #tpu.memory_space<vmem>>) target_semaphore(%90 : memref<!tpu.dma_semaphore, #tpu.memory_space<semaphore_mem>>)
      %91 = arith.addi %0, %24 : i32
      %c6_i32 = arith.constant 6 : i32
      %92 = arith.addi %91, %c6_i32 : i32
      %93 = arith.index_cast %92 : i32 to index
      %94 = memref.load %arg1[%93] : memref<16xi32, #tpu.memory_space<smem>>
      %c6_i32_46 = arith.constant 6 : i32
      %95 = arith.addi %24, %c6_i32_46 : i32
      %c6_i32_47 = arith.constant 6 : i32
      %c0_i32_48 = arith.constant 0 : i32
      %96 = tpu.memref_slice %arg2[%94, %c0_i32_48] : memref<64x128xf32, #tpu.memory_space<any>> -> memref<1x128xf32, #tpu.memory_space<any>>
      %97 = tpu.memref_squeeze %96 : memref<1x128xf32, #tpu.memory_space<any>> -> memref<128xf32, #tpu.memory_space<any>>
      %c0_i32_49 = arith.constant 0 : i32
      %98 = tpu.memref_slice %arg9[%95, %c0_i32_49] : memref<16x128xf32, #tpu.memory_space<vmem>> -> memref<1x128xf32, #tpu.memory_space<vmem>>
      %99 = tpu.memref_squeeze %98 : memref<1x128xf32, #tpu.memory_space<vmem>> -> memref<128xf32, #tpu.memory_space<vmem>>
      %100 = tpu.memref_slice %arg10[%c6_i32_47] : memref<8x!tpu.dma_semaphore, #tpu.memory_space<semaphore_mem>> -> memref<1x!tpu.dma_semaphore, #tpu.memory_space<semaphore_mem>>
      %101 = tpu.memref_squeeze %100 : memref<1x!tpu.dma_semaphore, #tpu.memory_space<semaphore_mem>> -> memref<!tpu.dma_semaphore, #tpu.memory_space<semaphore_mem>>
      tpu.enqueue_dma source(%97 : memref<128xf32, #tpu.memory_space<any>>) target(%99 : memref<128xf32, #tpu.memory_space<vmem>>) target_semaphore(%101 : memref<!tpu.dma_semaphore, #tpu.memory_space<semaphore_mem>>)
      %102 = arith.addi %0, %24 : i32
      %c7_i32 = arith.constant 7 : i32
      %103 = arith.addi %102, %c7_i32 : i32
      %104 = arith.index_cast %103 : i32 to index
      %105 = memref.load %arg1[%104] : memref<16xi32, #tpu.memory_space<smem>>
      %c7_i32_50 = arith.constant 7 : i32
      %106 = arith.addi %24, %c7_i32_50 : i32
      %c7_i32_51 = arith.constant 7 : i32
      %c0_i32_52 = arith.constant 0 : i32
      %107 = tpu.memref_slice %arg2[%105, %c0_i32_52] : memref<64x128xf32, #tpu.memory_space<any>> -> memref<1x128xf32, #tpu.memory_space<any>>
      %108 = tpu.memref_squeeze %107 : memref<1x128xf32, #tpu.memory_space<any>> -> memref<128xf32, #tpu.memory_space<any>>
      %c0_i32_53 = arith.constant 0 : i32
      %109 = tpu.memref_slice %arg9[%106, %c0_i32_53] : memref<16x128xf32, #tpu.memory_space<vmem>> -> memref<1x128xf32, #tpu.memory_space<vmem>>
      %110 = tpu.memref_squeeze %109 : memref<1x128xf32, #tpu.memory_space<vmem>> -> memref<128xf32, #tpu.memory_space<vmem>>
      %111 = tpu.memref_slice %arg10[%c7_i32_51] : memref<8x!tpu.dma_semaphore, #tpu.memory_space<semaphore_mem>> -> memref<1x!tpu.dma_semaphore, #tpu.memory_space<semaphore_mem>>
      %112 = tpu.memref_squeeze %111 : memref<1x!tpu.dma_semaphore, #tpu.memory_space<semaphore_mem>> -> memref<!tpu.dma_semaphore, #tpu.memory_space<semaphore_mem>>
      tpu.enqueue_dma source(%108 : memref<128xf32, #tpu.memory_space<any>>) target(%110 : memref<128xf32, #tpu.memory_space<vmem>>) target_semaphore(%112 : memref<!tpu.dma_semaphore, #tpu.memory_space<semaphore_mem>>)
      %c0_i32_54 = arith.constant 0 : i32
      %113 = arith.addi %24, %c0_i32_54 : i32
      %c0_i32_55 = arith.constant 0 : i32
      %c0_i32_56 = arith.constant 0 : i32
      %c0_i32_57 = arith.constant 0 : i32
      %114 = tpu.memref_slice %arg2[%c0_i32_55, %c0_i32_57] : memref<64x128xf32, #tpu.memory_space<any>> -> memref<1x128xf32, #tpu.memory_space<any>>
      %115 = tpu.memref_squeeze %114 : memref<1x128xf32, #tpu.memory_space<any>> -> memref<128xf32, #tpu.memory_space<any>>
      %c0_i32_58 = arith.constant 0 : i32
      %116 = tpu.memref_slice %arg9[%113, %c0_i32_58] : memref<16x128xf32, #tpu.memory_space<vmem>> -> memref<1x128xf32, #tpu.memory_space<vmem>>
      %117 = tpu.memref_squeeze %116 : memref<1x128xf32, #tpu.memory_space<vmem>> -> memref<128xf32, #tpu.memory_space<vmem>>
      %118 = tpu.memref_slice %arg10[%c0_i32_56] : memref<8x!tpu.dma_semaphore, #tpu.memory_space<semaphore_mem>> -> memref<1x!tpu.dma_semaphore, #tpu.memory_space<semaphore_mem>>
      %119 = tpu.memref_squeeze %118 : memref<1x!tpu.dma_semaphore, #tpu.memory_space<semaphore_mem>> -> memref<!tpu.dma_semaphore, #tpu.memory_space<semaphore_mem>>
      tpu.wait_dma2 semaphore(%119 : memref<!tpu.dma_semaphore, #tpu.memory_space<semaphore_mem>>) src(%115 : memref<128xf32, #tpu.memory_space<any>>) dst(%117 : memref<128xf32, #tpu.memory_space<vmem>>)
      %c1_i32_59 = arith.constant 1 : i32
      %120 = arith.addi %24, %c1_i32_59 : i32
      %c0_i32_60 = arith.constant 0 : i32
      %c1_i32_61 = arith.constant 1 : i32
      %c0_i32_62 = arith.constant 0 : i32
      %121 = tpu.memref_slice %arg2[%c0_i32_60, %c0_i32_62] : memref<64x128xf32, #tpu.memory_space<any>> -> memref<1x128xf32, #tpu.memory_space<any>>
      %122 = tpu.memref_squeeze %121 : memref<1x128xf32, #tpu.memory_space<any>> -> memref<128xf32, #tpu.memory_space<any>>
      %c0_i32_63 = arith.constant 0 : i32
      %123 = tpu.memref_slice %arg9[%120, %c0_i32_63] : memref<16x128xf32, #tpu.memory_space<vmem>> -> memref<1x128xf32, #tpu.memory_space<vmem>>
      %124 = tpu.memref_squeeze %123 : memref<1x128xf32, #tpu.memory_space<vmem>> -> memref<128xf32, #tpu.memory_space<vmem>>
      %125 = tpu.memref_slice %arg10[%c1_i32_61] : memref<8x!tpu.dma_semaphore, #tpu.memory_space<semaphore_mem>> -> memref<1x!tpu.dma_semaphore, #tpu.memory_space<semaphore_mem>>
      %126 = tpu.memref_squeeze %125 : memref<1x!tpu.dma_semaphore, #tpu.memory_space<semaphore_mem>> -> memref<!tpu.dma_semaphore, #tpu.memory_space<semaphore_mem>>
      tpu.wait_dma2 semaphore(%126 : memref<!tpu.dma_semaphore, #tpu.memory_space<semaphore_mem>>) src(%122 : memref<128xf32, #tpu.memory_space<any>>) dst(%124 : memref<128xf32, #tpu.memory_space<vmem>>)
      %c2_i32_64 = arith.constant 2 : i32
      %127 = arith.addi %24, %c2_i32_64 : i32
      %c0_i32_65 = arith.constant 0 : i32
      %c2_i32_66 = arith.constant 2 : i32
      %c0_i32_67 = arith.constant 0 : i32
      %128 = tpu.memref_slice %arg2[%c0_i32_65, %c0_i32_67] : memref<64x128xf32, #tpu.memory_space<any>> -> memref<1x128xf32, #tpu.memory_space<any>>
      %129 = tpu.memref_squeeze %128 : memref<1x128xf32, #tpu.memory_space<any>> -> memref<128xf32, #tpu.memory_space<any>>
      %c0_i32_68 = arith.constant 0 : i32
      %130 = tpu.memref_slice %arg9[%127, %c0_i32_68] : memref<16x128xf32, #tpu.memory_space<vmem>> -> memref<1x128xf32, #tpu.memory_space<vmem>>
      %131 = tpu.memref_squeeze %130 : memref<1x128xf32, #tpu.memory_space<vmem>> -> memref<128xf32, #tpu.memory_space<vmem>>
      %132 = tpu.memref_slice %arg10[%c2_i32_66] : memref<8x!tpu.dma_semaphore, #tpu.memory_space<semaphore_mem>> -> memref<1x!tpu.dma_semaphore, #tpu.memory_space<semaphore_mem>>
      %133 = tpu.memref_squeeze %132 : memref<1x!tpu.dma_semaphore, #tpu.memory_space<semaphore_mem>> -> memref<!tpu.dma_semaphore, #tpu.memory_space<semaphore_mem>>
      tpu.wait_dma2 semaphore(%133 : memref<!tpu.dma_semaphore, #tpu.memory_space<semaphore_mem>>) src(%129 : memref<128xf32, #tpu.memory_space<any>>) dst(%131 : memref<128xf32, #tpu.memory_space<vmem>>)
      %c3_i32_69 = arith.constant 3 : i32
      %134 = arith.addi %24, %c3_i32_69 : i32
      %c0_i32_70 = arith.constant 0 : i32
      %c3_i32_71 = arith.constant 3 : i32
      %c0_i32_72 = arith.constant 0 : i32
      %135 = tpu.memref_slice %arg2[%c0_i32_70, %c0_i32_72] : memref<64x128xf32, #tpu.memory_space<any>> -> memref<1x128xf32, #tpu.memory_space<any>>
      %136 = tpu.memref_squeeze %135 : memref<1x128xf32, #tpu.memory_space<any>> -> memref<128xf32, #tpu.memory_space<any>>
      %c0_i32_73 = arith.constant 0 : i32
      %137 = tpu.memref_slice %arg9[%134, %c0_i32_73] : memref<16x128xf32, #tpu.memory_space<vmem>> -> memref<1x128xf32, #tpu.memory_space<vmem>>
      %138 = tpu.memref_squeeze %137 : memref<1x128xf32, #tpu.memory_space<vmem>> -> memref<128xf32, #tpu.memory_space<vmem>>
      %139 = tpu.memref_slice %arg10[%c3_i32_71] : memref<8x!tpu.dma_semaphore, #tpu.memory_space<semaphore_mem>> -> memref<1x!tpu.dma_semaphore, #tpu.memory_space<semaphore_mem>>
      %140 = tpu.memref_squeeze %139 : memref<1x!tpu.dma_semaphore, #tpu.memory_space<semaphore_mem>> -> memref<!tpu.dma_semaphore, #tpu.memory_space<semaphore_mem>>
      tpu.wait_dma2 semaphore(%140 : memref<!tpu.dma_semaphore, #tpu.memory_space<semaphore_mem>>) src(%136 : memref<128xf32, #tpu.memory_space<any>>) dst(%138 : memref<128xf32, #tpu.memory_space<vmem>>)
      %c4_i32_74 = arith.constant 4 : i32
      %141 = arith.addi %24, %c4_i32_74 : i32
      %c0_i32_75 = arith.constant 0 : i32
      %c4_i32_76 = arith.constant 4 : i32
      %c0_i32_77 = arith.constant 0 : i32
      %142 = tpu.memref_slice %arg2[%c0_i32_75, %c0_i32_77] : memref<64x128xf32, #tpu.memory_space<any>> -> memref<1x128xf32, #tpu.memory_space<any>>
      %143 = tpu.memref_squeeze %142 : memref<1x128xf32, #tpu.memory_space<any>> -> memref<128xf32, #tpu.memory_space<any>>
      %c0_i32_78 = arith.constant 0 : i32
      %144 = tpu.memref_slice %arg9[%141, %c0_i32_78] : memref<16x128xf32, #tpu.memory_space<vmem>> -> memref<1x128xf32, #tpu.memory_space<vmem>>
      %145 = tpu.memref_squeeze %144 : memref<1x128xf32, #tpu.memory_space<vmem>> -> memref<128xf32, #tpu.memory_space<vmem>>
      %146 = tpu.memref_slice %arg10[%c4_i32_76] : memref<8x!tpu.dma_semaphore, #tpu.memory_space<semaphore_mem>> -> memref<1x!tpu.dma_semaphore, #tpu.memory_space<semaphore_mem>>
      %147 = tpu.memref_squeeze %146 : memref<1x!tpu.dma_semaphore, #tpu.memory_space<semaphore_mem>> -> memref<!tpu.dma_semaphore, #tpu.memory_space<semaphore_mem>>
      tpu.wait_dma2 semaphore(%147 : memref<!tpu.dma_semaphore, #tpu.memory_space<semaphore_mem>>) src(%143 : memref<128xf32, #tpu.memory_space<any>>) dst(%145 : memref<128xf32, #tpu.memory_space<vmem>>)
      %c5_i32_79 = arith.constant 5 : i32
      %148 = arith.addi %24, %c5_i32_79 : i32
      %c0_i32_80 = arith.constant 0 : i32
      %c5_i32_81 = arith.constant 5 : i32
      %c0_i32_82 = arith.constant 0 : i32
      %149 = tpu.memref_slice %arg2[%c0_i32_80, %c0_i32_82] : memref<64x128xf32, #tpu.memory_space<any>> -> memref<1x128xf32, #tpu.memory_space<any>>
      %150 = tpu.memref_squeeze %149 : memref<1x128xf32, #tpu.memory_space<any>> -> memref<128xf32, #tpu.memory_space<any>>
      %c0_i32_83 = arith.constant 0 : i32
      %151 = tpu.memref_slice %arg9[%148, %c0_i32_83] : memref<16x128xf32, #tpu.memory_space<vmem>> -> memref<1x128xf32, #tpu.memory_space<vmem>>
      %152 = tpu.memref_squeeze %151 : memref<1x128xf32, #tpu.memory_space<vmem>> -> memref<128xf32, #tpu.memory_space<vmem>>
      %153 = tpu.memref_slice %arg10[%c5_i32_81] : memref<8x!tpu.dma_semaphore, #tpu.memory_space<semaphore_mem>> -> memref<1x!tpu.dma_semaphore, #tpu.memory_space<semaphore_mem>>
      %154 = tpu.memref_squeeze %153 : memref<1x!tpu.dma_semaphore, #tpu.memory_space<semaphore_mem>> -> memref<!tpu.dma_semaphore, #tpu.memory_space<semaphore_mem>>
      tpu.wait_dma2 semaphore(%154 : memref<!tpu.dma_semaphore, #tpu.memory_space<semaphore_mem>>) src(%150 : memref<128xf32, #tpu.memory_space<any>>) dst(%152 : memref<128xf32, #tpu.memory_space<vmem>>)
      %c6_i32_84 = arith.constant 6 : i32
      %155 = arith.addi %24, %c6_i32_84 : i32
      %c0_i32_85 = arith.constant 0 : i32
      %c6_i32_86 = arith.constant 6 : i32
      %c0_i32_87 = arith.constant 0 : i32
      %156 = tpu.memref_slice %arg2[%c0_i32_85, %c0_i32_87] : memref<64x128xf32, #tpu.memory_space<any>> -> memref<1x128xf32, #tpu.memory_space<any>>
      %157 = tpu.memref_squeeze %156 : memref<1x128xf32, #tpu.memory_space<any>> -> memref<128xf32, #tpu.memory_space<any>>
      %c0_i32_88 = arith.constant 0 : i32
      %158 = tpu.memref_slice %arg9[%155, %c0_i32_88] : memref<16x128xf32, #tpu.memory_space<vmem>> -> memref<1x128xf32, #tpu.memory_space<vmem>>
      %159 = tpu.memref_squeeze %158 : memref<1x128xf32, #tpu.memory_space<vmem>> -> memref<128xf32, #tpu.memory_space<vmem>>
      %160 = tpu.memref_slice %arg10[%c6_i32_86] : memref<8x!tpu.dma_semaphore, #tpu.memory_space<semaphore_mem>> -> memref<1x!tpu.dma_semaphore, #tpu.memory_space<semaphore_mem>>
      %161 = tpu.memref_squeeze %160 : memref<1x!tpu.dma_semaphore, #tpu.memory_space<semaphore_mem>> -> memref<!tpu.dma_semaphore, #tpu.memory_space<semaphore_mem>>
      tpu.wait_dma2 semaphore(%161 : memref<!tpu.dma_semaphore, #tpu.memory_space<semaphore_mem>>) src(%157 : memref<128xf32, #tpu.memory_space<any>>) dst(%159 : memref<128xf32, #tpu.memory_space<vmem>>)
      %c7_i32_89 = arith.constant 7 : i32
      %162 = arith.addi %24, %c7_i32_89 : i32
      %c0_i32_90 = arith.constant 0 : i32
      %c7_i32_91 = arith.constant 7 : i32
      %c0_i32_92 = arith.constant 0 : i32
      %163 = tpu.memref_slice %arg2[%c0_i32_90, %c0_i32_92] : memref<64x128xf32, #tpu.memory_space<any>> -> memref<1x128xf32, #tpu.memory_space<any>>
      %164 = tpu.memref_squeeze %163 : memref<1x128xf32, #tpu.memory_space<any>> -> memref<128xf32, #tpu.memory_space<any>>
      %c0_i32_93 = arith.constant 0 : i32
      %165 = tpu.memref_slice %arg9[%162, %c0_i32_93] : memref<16x128xf32, #tpu.memory_space<vmem>> -> memref<1x128xf32, #tpu.memory_space<vmem>>
      %166 = tpu.memref_squeeze %165 : memref<1x128xf32, #tpu.memory_space<vmem>> -> memref<128xf32, #tpu.memory_space<vmem>>
      %167 = tpu.memref_slice %arg10[%c7_i32_91] : memref<8x!tpu.dma_semaphore, #tpu.memory_space<semaphore_mem>> -> memref<1x!tpu.dma_semaphore, #tpu.memory_space<semaphore_mem>>
      %168 = tpu.memref_squeeze %167 : memref<1x!tpu.dma_semaphore, #tpu.memory_space<semaphore_mem>> -> memref<!tpu.dma_semaphore, #tpu.memory_space<semaphore_mem>>
      tpu.wait_dma2 semaphore(%168 : memref<!tpu.dma_semaphore, #tpu.memory_space<semaphore_mem>>) src(%164 : memref<128xf32, #tpu.memory_space<any>>) dst(%166 : memref<128xf32, #tpu.memory_space<vmem>>)
    }
    %c2_i32_0 = arith.constant 2 : i32
    %c0 = arith.constant 0 : index
    %c0_1 = arith.constant 0 : index
    %2 = vector.load %arg9[%c0, %c0_1] : memref<16x128xf32, #tpu.memory_space<vmem>>, vector<16x128xf32>
    %3 = arith.truncf %2 : vector<16x128xf32> to vector<16x128xbf16>
    %c0_2 = arith.constant 0 : index
    %c0_3 = arith.constant 0 : index
    %4 = vector.load %arg3[%c0_2, %c0_3] : memref<128x128xbf16, #tpu.memory_space<vmem>>, vector<128x128xbf16>
    %cst = arith.constant dense<0.000000e+00> : vector<16x128xf32>
    %5 = tpu.matmul %3, %4, %cst {dimension_numbers = #tpu.dot_dimension_numbers<[1], [0], [0], [1], [0, 0, 1, 1], [], []>} : vector<16x128xbf16>, vector<128x128xbf16>, vector<16x128xf32> -> vector<16x128xf32>
    %c0_4 = arith.constant 0 : index
    %c0_5 = arith.constant 0 : index
    %6 = vector.load %arg4[%c0_4, %c0_5] : memref<1x128xf32, #tpu.memory_space<vmem>>, vector<1x128xf32>
    %7 = vector.broadcast %6 : vector<1x128xf32> to vector<16x128xf32>
    %8 = arith.addf %5, %7 : vector<16x128xf32>
    %c0_6 = arith.constant 0 : index
    %c0_7 = arith.constant 0 : index
    %9 = vector.load %arg5[%c0_6, %c0_7] : memref<128x128xbf16, #tpu.memory_space<vmem>>, vector<128x128xbf16>
    %cst_8 = arith.constant dense<0.000000e+00> : vector<16x128xf32>
    %10 = tpu.matmul %3, %9, %cst_8 {dimension_numbers = #tpu.dot_dimension_numbers<[1], [0], [0], [1], [0, 0, 1, 1], [], []>} : vector<16x128xbf16>, vector<128x128xbf16>, vector<16x128xf32> -> vector<16x128xf32>
    %11 = arith.truncf %8 : vector<16x128xf32> to vector<16x128xbf16>
    %c0_9 = arith.constant 0 : index
    %c0_10 = arith.constant 0 : index
    %12 = vector.load %arg6[%c0_9, %c0_10] : memref<128x128xbf16, #tpu.memory_space<vmem>>, vector<128x128xbf16>
    %cst_11 = arith.constant dense<0.000000e+00> : vector<16x128xf32>
    %13 = tpu.matmul %11, %12, %cst_11 {dimension_numbers = #tpu.dot_dimension_numbers<[1], [0], [0], [1], [0, 0, 1, 1], [], []>} : vector<16x128xbf16>, vector<128x128xbf16>, vector<16x128xf32> -> vector<16x128xf32>
    %14 = arith.addf %10, %13 : vector<16x128xf32>
    %cst_12 = arith.constant 5.000000e-01 : f32
    %15 = vector.broadcast %cst_12 : f32 to vector<16x128xf32>
    %16 = arith.mulf %15, %14 : vector<16x128xf32>
    %c0_13 = arith.constant 0 : index
    %c0_14 = arith.constant 0 : index
    %17 = vector.load %arg7[%c0_13, %c0_14] : memref<1x128xf32, #tpu.memory_space<vmem>>, vector<1x128xf32>
    %18 = vector.broadcast %17 : vector<1x128xf32> to vector<16x128xf32>
    %19 = arith.addf %16, %18 : vector<16x128xf32>
    %c0_15 = arith.constant 0 : index
    %c0_16 = arith.constant 0 : index
    %20 = vector.load %arg8[%c0_15, %c0_16] : memref<16x128xf32, #tpu.memory_space<vmem>>, vector<16x128xf32>
    tpu.vector_store %arg8[%c0_15, %c0_16], %19 {strides = array<i32>} : memref<16x128xf32, #tpu.memory_space<vmem>>, vector<16x128xf32>,
    return
  }
  func.func @transform_1(%arg0: i32, %arg1: memref<16xi32, #tpu.memory_space<smem>>) -> (i32, i32) {
    %c0_i32 = arith.constant 0 : i32
    %c0_i32_0 = arith.constant 0 : i32
    %c0_i32_1 = arith.constant 0 : i32
    return %c0_i32, %c0_i32_0 : i32, i32
  }
  func.func @transform_2(%arg0: i32, %arg1: memref<16xi32, #tpu.memory_space<smem>>) -> (i32, i32) {
    %c0_i32 = arith.constant 0 : i32
    %c0_i32_0 = arith.constant 0 : i32
    %c0_i32_1 = arith.constant 0 : i32
    return %c0_i32, %c0_i32_0 : i32, i32
  }
  func.func @transform_3(%arg0: i32, %arg1: memref<16xi32, #tpu.memory_space<smem>>) -> (i32, i32) {
    %c0_i32 = arith.constant 0 : i32
    %c0_i32_0 = arith.constant 0 : i32
    %c0_i32_1 = arith.constant 0 : i32
    return %c0_i32, %c0_i32_0 : i32, i32
  }
  func.func @transform_4(%arg0: i32, %arg1: memref<16xi32, #tpu.memory_space<smem>>) -> (i32, i32) {
    %c0_i32 = arith.constant 0 : i32
    %c0_i32_0 = arith.constant 0 : i32
    %c0_i32_1 = arith.constant 0 : i32
    return %c0_i32, %c0_i32_0 : i32, i32
  }
  func.func @transform_5(%arg0: i32, %arg1: memref<16xi32, #tpu.memory_space<smem>>) -> (i32, i32) {
    %c0_i32 = arith.constant 0 : i32
    %c0_i32_0 = arith.constant 0 : i32
    %c0_i32_1 = arith.constant 0 : i32
    return %c0_i32, %c0_i32_0 : i32, i32
  }
  func.func @transform_6(%arg0: i32, %arg1: memref<16xi32, #tpu.memory_space<smem>>) -> (i32, i32) {
    %c0_i32 = arith.constant 0 : i32
    %c0_i32_0 = arith.constant 0 : i32
    return %arg0, %c0_i32 : i32, i32
  }
}

</mosaic_0001>

<bundles_post_ra>
// kernel: tpu_custom_call.1
= control target key start
LH: loop header
LB: loop body
LE: loop exit
PB: predicated region body
PF: predicated region fallthrough
CT: control target
= control target key end

     0   :  { %s1102_s27 = smov [#allocation5]   ;;  %s1341_s0 = inlined_call_operand.hbm [shape: s32[16], index: 0, kind: input, shape index: {}]   ;;  %s1342_s1 = inlined_call_operand.hbm [shape: f32[64,128], index: 1, kind: input, shape index: {}]   ;;  %s1343_s2 = inlined_call_operand.hbm [shape: bf16[128,128], index: 2, kind: input, shape index: {}]   ;;  %s1344_s3 = inlined_call_operand.vmem [shape: f32[1,128], index: 3, kind: input, shape index: {}]   ;;  %s1345_s4 = inlined_call_operand.hbm [shape: bf16[128,128], index: 4, kind: input, shape index: {}]   ;;  %s1346_s5 = inlined_call_operand.hbm [shape: bf16[128,128], index: 5, kind: input, shape index: {}]   ;;  %s1347_s6 = inlined_call_operand.vmem [shape: f32[1,128], index: 6, kind: input, shape index: {}]   ;;  %s1348_s7 = inlined_call_operand.hbm [shape: f32[16,128], index: 7, kind: output, shape index: {}]  }
   0x1   :  { %s13_s26 = sshll.u32 %s1341_s0, 4  ;;  %s14_s26 = int_to_ptr.hbm [resolvable:$true] %s13_s26 }
   0x2   :  { %16 = dma.hbm_to_smem %s14_s26, 16, %s1102_s27, [#allocation4] }
   0x3   :  { %1074 = dma.done.wait [#allocation4], 16 }
   0x4   :  { %1075 = vsyncadd [#allocation4], 4294967280 }
   0x5   :  { %19 = sfence }
   0x6   :  { %20 = vsyncpa [#allocation7], 0 }
   0x7   :  { %21 = vsyncpa [#allocation10], 0 }
   0x8   :  { %22 = vsyncpa [#allocation8], 0  ;;  %s42_s30 = sshll.u32 %s1345_s4, 4  ;;  %s1103_s8 = smov [#allocation9]   ;;  %s43_s30 = int_to_ptr.hbm [resolvable:$true] %s42_s30 }
   0x9   :  { %s44_s9 = sshll.u32 %s1103_s8, 4  ;;  %s27_s0 = sshll.u32 %s1343_s2, 4  ;;  %s45_s9 = int_to_ptr.vmem [resolvable:$true] %s44_s9  ;;  %s28_s0 = int_to_ptr.hbm [resolvable:$true] %s27_s0 }
   0xa   :  { %s1104_s12 = smov 64   ;;  %s1105_s13 = smov 4  }
   0xb   :  { %50 = dma.hbm_to_vmem [thread:$0]  %s43_s30, 1024, %s45_s9, [#allocation10], %s1104_s12, %s1104_s12, %s1105_s13  }
   0xc   :  { %s1106_s14 = smov [#allocation6]   ;;  %s55_s18 = sshll.u32 %s1346_s5, 4  ;;  %s56_s18 = int_to_ptr.hbm [resolvable:$true] %s55_s18 }
   0xd   :  { %s29_s15 = sshll.u32 %s1106_s14, 4  ;;  %s1107_s4 = smov [#allocation11]   ;;  %s30_s15 = int_to_ptr.vmem [resolvable:$true] %s29_s15 }
   0xe   :  { %35 = dma.hbm_to_vmem [thread:$0]  %s28_s0, 1024, %s30_s15, [#allocation7], %s1104_s12, %s1104_s12, %s1105_s13  }
   0xf   :  { %s57_s19 = sshll.u32 %s1107_s4, 4  ;;  %s58_s19 = int_to_ptr.vmem [resolvable:$true] %s57_s19 }
  0x10   :  { %63 = dma.hbm_to_vmem [thread:$0]  %s56_s18, 1024, %s58_s19, [#allocation10], %s1104_s12, %s1104_s12, %s1105_s13  }
  0x11   :  { %1076 = dma.done.wait [#allocation7], 1024  }
  0x12   :  { %1077 = vsyncadd [#allocation7], 4294966272 }
  0x13   :  { %1078 = dma.done.wait [#allocation10], 2048  }
  0x14   :  { %1079 = vsyncadd [#allocation10], 4294965248  ;;  %s1164_s2 = smov 0  }
  0x15 LB: > { %s1170_s5 = sshll.u32 %s1100_s2, 3  ;;  %s1203_s18 = scalar_lea.hbm %s1342_s1, 64  ;;  %s1100_s2 = sphi %s1164_s2, %s84_s2  }
  0x16   : > { %s87_s20 = sld [smem:[#allocation5 + %s1170_s5]]  ;;  %s1174_s21 = scalar_lea.vmem [#allocation2], %s1170_s5 }
  0x17   : > { %s99_s22 = sshll.u32 %s1174_s21, 4  ;;  %s103_s23 = sadd.s32 1, %s1170_s5  ;;  %s1178_s22 = int_to_ptr.vmem [resolvable:$true] %s99_s22 }
  0x18   : > { %s1180_s24 = sld [smem:[#allocation5 + %s103_s23]]  ;;  %s585_s25 = scalar_lea.vmem %s1174_s21, 1 [#allocation2] }
  0x19   : > { %s122_s26 = sadd.s32 2, %s1170_s5  ;;  %s1184_s27 = sshll.u32 %s585_s25, 4  ;;  %s119_s27 = int_to_ptr.vmem [resolvable:$true] %s1184_s27 }
  0x1a   : > { %s1186_s28 = sld [smem:[#allocation5 + %s122_s26]]  ;;  %s589_s29 = scalar_lea.vmem %s1174_s21, 2 [#allocation2] }
  0x1b   : > { %s1193_s10 = sshll.u32 %s589_s29, 4  ;;  %s138_s10 = int_to_ptr.vmem [resolvable:$true] %s1193_s10 }
  0x1c   : > { %s88_s9 = scalar_lea.hbm %s1342_s1, %s87_s20 }
  0x1d   : > { %s97_s11 = sshll.u32 %s88_s9, 4  ;;  %s98_s11 = int_to_ptr.hbm [resolvable:$true] %s97_s11 }
  0x1e   : > { %s106_s13 = scalar_lea.hbm %s1342_s1, %s1180_s24  ;;  %s854_s14 = sshra.s32 %s98_s11, 4  ;;  %s855_s14 = int_to_ptr.hbm [resolvable:$true] %s854_s14 }
  0x1f   : > { %s856_s15 = scalar_lea.hbm %s855_s14, 1  ;;  %p859_p1 = scmp.lt.s32.totalorder %s855_s14, %s1342_s1 }
  0x20   : > { %p857_p0 = scmp.ne.s32.totalorder %s855_s14, %s856_s15  ;;  %p860_p2 = scmp.lt.s32.totalorder %s1203_s18, %s856_s15 }
  0x22   : > { %p861_p3 = por %p860_p2, %p859_p1 }
  0x24   : > { %p862_p4 = pnand %p861_p3, %p857_p0 }
  0x26   : > { %865 = shalt.err (!%p862_p4)  }
  0x27   : > { %s866_s20 = sshra.s32 %s1178_s22, 4  ;;  %s1108_s24 = smov [#allocation2]   ;;  %s867_s20 = int_to_ptr.vmem [resolvable:$true] %s866_s20 }
  0x28   : > { %s868_s23 = scalar_lea.vmem %s867_s20, 1  ;;  %s1210_s25 = scalar_lea.vmem %s1108_s24, 16 }
  0x29   : > { %p869_p5 = scmp.ne.s32.totalorder %s867_s20, %s868_s23  ;;  %p871_p6 = scmp.lt.s32.totalorder %s867_s20, [#allocation2] }
  0x2a   : > { %p872_p7 = scmp.lt.s32.totalorder %s1210_s25, %s868_s23 }
  0x2c   : > { %p873_p8 = por %p872_p7, %p871_p6 }
  0x2e   : > { %p874_p9 = pnand %p873_p8, %p869_p5 }
  0x30   : > { %877 = shalt.err (!%p874_p9)  }
  0x31   : > { %102 = dma.hbm_to_vmem [thread:$0]  %s98_s11, 16, %s1178_s22, [#allocation3] }
  0x32   : > { %s116_s26 = sshll.u32 %s106_s13, 4  ;;  %s125_s8 = scalar_lea.hbm %s1342_s1, %s1186_s28  ;;  %s117_s26 = int_to_ptr.hbm [resolvable:$true] %s116_s26 }
  0x33   : > { %s1218_s9 = sshll.u32 %s125_s8, 4  ;;  %s878_s0 = sshra.s32 %s117_s26, 4  ;;  %s879_s0 = int_to_ptr.hbm [resolvable:$true] %s878_s0  ;;  %s136_s9 = int_to_ptr.hbm [resolvable:$true] %s1218_s9 }
  0x34   : > { %s880_s12 = scalar_lea.hbm %s879_s0, 1  ;;  %p883_p11 = scmp.lt.s32.totalorder %s879_s0, %s1342_s1 }
  0x35   : > { %p881_p10 = scmp.ne.s32.totalorder %s879_s0, %s880_s12  ;;  %p884_p12 = scmp.lt.s32.totalorder %s1203_s18, %s880_s12 }
  0x37   : > { %p885_p13 = por %p884_p12, %p883_p11 }
  0x39   : > { %p886_p0 = pnand %p885_p13, %p881_p10 }
  0x3b   : > { %889 = shalt.err (!%p886_p0)  }
  0x3c   : > { %s890_s22 = sshra.s32 %s119_s27, 4  ;;  %s891_s22 = int_to_ptr.vmem [resolvable:$true] %s890_s22 }
  0x3d   : > { %s892_s28 = scalar_lea.vmem %s891_s22, 1  ;;  %p895_p2 = scmp.lt.s32.totalorder %s891_s22, [#allocation2] }
  0x3e   : > { %p893_p1 = scmp.ne.s32.totalorder %s891_s22, %s892_s28  ;;  %p896_p3 = scmp.lt.s32.totalorder %s1210_s25, %s892_s28 }
  0x40   : > { %p897_p4 = por %p896_p3, %p895_p2 }
  0x42   : > { %p898_p5 = pnand %p897_p4, %p893_p1 }
  0x44   : > { %901 = shalt.err (!%p898_p5)  }
  0x45   : > { %121 = dma.hbm_to_vmem [thread:$0]  %s117_s26, 16, %s119_s27, [#allocation3 + $0x1] }
  0x46   : > { %s141_s11 = sadd.s32 3, %s1170_s5  ;;  %s902_s13 = sshra.s32 %s136_s9, 4  ;;  %s903_s13 = int_to_ptr.hbm [resolvable:$true] %s902_s13 }
  0x47   : > { %s904_s16 = scalar_lea.hbm %s903_s13, 1  ;;  %p907_p7 = scmp.lt.s32.totalorder %s903_s13, %s1342_s1 }
  0x48   : > { %p905_p6 = scmp.ne.s32.totalorder %s903_s13, %s904_s16  ;;  %p908_p8 = scmp.lt.s32.totalorder %s1203_s18, %s904_s16 }
  0x4a   : > { %p909_p9 = por %p908_p8, %p907_p7 }
  0x4c   : > { %p910_p10 = pnand %p909_p9, %p905_p6 }
  0x4e   : > { %913 = shalt.err (!%p910_p10)  }
  0x4f   : > { %s914_s19 = sshra.s32 %s138_s10, 4  ;;  %s915_s19 = int_to_ptr.vmem [resolvable:$true] %s914_s19 }
  0x50   : > { %s916_s27 = scalar_lea.vmem %s915_s19, 1  ;;  %p919_p12 = scmp.lt.s32.totalorder %s915_s19, [#allocation2] }
  0x51   : > { %p917_p11 = scmp.ne.s32.totalorder %s915_s19, %s916_s27  ;;  %p920_p13 = scmp.lt.s32.totalorder %s1210_s25, %s916_s27 }
  0x53   : > { %p921_p0 = por %p920_p13, %p919_p12 }
  0x55   : > { %p922_p1 = pnand %p921_p0, %p917_p11 }
  0x57   : > { %925 = shalt.err (!%p922_p1)  }
  0x58   : > { %140 = dma.hbm_to_vmem [thread:$0]  %s136_s9, 16, %s138_s10, [#allocation3 + $0x2] }
  0x59   : > { %s142_s20 = sld [smem:[#allocation5 + %s141_s11]]  ;;  %s593_s23 = scalar_lea.vmem %s1174_s21, 3 [#allocation2] }
  0x5a   : > { %s1241_s24 = sshll.u32 %s593_s23, 4  ;;  %s160_s26 = sadd.s32 4, %s1170_s5  ;;  %s157_s24 = int_to_ptr.vmem [resolvable:$true] %s1241_s24 }
  0x5b   : > { %s1245_s29 = sld [smem:[#allocation5 + %s160_s26]]  ;;  %s597_s30 = scalar_lea.vmem %s1174_s21, 4 [#allocation2] }
  0x5c   : > { %s179_s8 = sadd.s32 5, %s1170_s5  ;;  %s1249_s0 = sshll.u32 %s597_s30, 4  ;;  %s176_s0 = int_to_ptr.vmem [resolvable:$true] %s1249_s0 }
  0x5d   : > { %s1251_s12 = sld [smem:[#allocation5 + %s179_s8]]  ;;  %s601_s10 = scalar_lea.vmem %s1174_s21, 5 [#allocation2] }
  0x5e   : > { %s1258_s22 = sshll.u32 %s601_s10, 4  ;;  %s195_s22 = int_to_ptr.vmem [resolvable:$true] %s1258_s22 }
  0x5f   : > { %s144_s15 = scalar_lea.hbm %s1342_s1, %s142_s20 }
  0x60   : > { %s154_s28 = sshll.u32 %s144_s15, 4  ;;  %s155_s28 = int_to_ptr.hbm [resolvable:$true] %s154_s28 }
  0x61   : > { %s163_s16 = scalar_lea.hbm %s1342_s1, %s1245_s29  ;;  %s926_s17 = sshra.s32 %s155_s28, 4  ;;  %s927_s17 = int_to_ptr.hbm [resolvable:$true] %s926_s17 }
  0x62   : > { %s928_s4 = scalar_lea.hbm %s927_s17, 1  ;;  %p931_p3 = scmp.lt.s32.totalorder %s927_s17, %s1342_s1 }
  0x63   : > { %p929_p2 = scmp.ne.s32.totalorder %s927_s17, %s928_s4  ;;  %p932_p4 = scmp.lt.s32.totalorder %s1203_s18, %s928_s4 }
  0x65   : > { %p933_p5 = por %p932_p4, %p931_p3 }
  0x67   : > { %p934_p6 = pnand %p933_p5, %p929_p2 }
  0x69   : > { %937 = shalt.err (!%p934_p6)  }
  0x6a   : > { %s938_s20 = sshra.s32 %s157_s24, 4  ;;  %s939_s20 = int_to_ptr.vmem [resolvable:$true] %s938_s20 }
  0x6b   : > { %s940_s23 = scalar_lea.vmem %s939_s20, 1  ;;  %p943_p8 = scmp.lt.s32.totalorder %s939_s20, [#allocation2] }
  0x6c   : > { %p941_p7 = scmp.ne.s32.totalorder %s939_s20, %s940_s23  ;;  %p944_p9 = scmp.lt.s32.totalorder %s1210_s25, %s940_s23 }
  0x6e   : > { %p945_p10 = por %p944_p9, %p943_p8 }
  0x70   : > { %p946_p11 = pnand %p945_p10, %p941_p7 }
  0x72   : > { %949 = shalt.err (!%p946_p11)  }
  0x73   : > { %159 = dma.hbm_to_vmem [thread:$0]  %s155_s28, 16, %s157_s24, [#allocation3 + $0x3] }
  0x74   : > { %s173_s26 = sshll.u32 %s163_s16, 4  ;;  %s182_s8 = scalar_lea.hbm %s1342_s1, %s1251_s12  ;;  %s174_s26 = int_to_ptr.hbm [resolvable:$true] %s173_s26 }
  0x75   : > { %s1278_s10 = sshll.u32 %s182_s8, 4  ;;  %s950_s9 = sshra.s32 %s174_s26, 4  ;;  %s951_s9 = int_to_ptr.hbm [resolvable:$true] %s950_s9  ;;  %s193_s10 = int_to_ptr.hbm [resolvable:$true] %s1278_s10 }
  0x76   : > { %s952_s14 = scalar_lea.hbm %s951_s9, 1  ;;  %p955_p13 = scmp.lt.s32.totalorder %s951_s9, %s1342_s1 }
  0x77   : > { %p953_p12 = scmp.ne.s32.totalorder %s951_s9, %s952_s14  ;;  %p956_p0 = scmp.lt.s32.totalorder %s1203_s18, %s952_s14 }
  0x79   : > { %p957_p1 = por %p956_p0, %p955_p13 }
  0x7b   : > { %p958_p2 = pnand %p957_p1, %p953_p12 }
  0x7d   : > { %961 = shalt.err (!%p958_p2)  }
  0x7e   : > { %s962_s24 = sshra.s32 %s176_s0, 4  ;;  %s963_s24 = int_to_ptr.vmem [resolvable:$true] %s962_s24 }
  0x7f   : > { %s964_s12 = scalar_lea.vmem %s963_s24, 1  ;;  %p967_p4 = scmp.lt.s32.totalorder %s963_s24, [#allocation2] }
  0x80   : > { %p965_p3 = scmp.ne.s32.totalorder %s963_s24, %s964_s12  ;;  %p968_p5 = scmp.lt.s32.totalorder %s1210_s25, %s964_s12 }
  0x82   : > { %p969_p6 = por %p968_p5, %p967_p4 }
  0x84   : > { %p970_p7 = pnand %p969_p6, %p965_p3 }
  0x86   : > { %973 = shalt.err (!%p970_p7)  }
  0x87   : > { %178 = dma.hbm_to_vmem [thread:$0]  %s174_s26, 16, %s176_s0, [#allocation3 + $0x4] }
  0x88   : > { %s198_s28 = sadd.s32 6, %s1170_s5  ;;  %s974_s13 = sshra.s32 %s193_s10, 4  ;;  %s975_s13 = int_to_ptr.hbm [resolvable:$true] %s974_s13 }
  0x89   : > { %s976_s16 = scalar_lea.hbm %s975_s13, 1  ;;  %p979_p9 = scmp.lt.s32.totalorder %s975_s13, %s1342_s1 }
  0x8a   : > { %p977_p8 = scmp.ne.s32.totalorder %s975_s13, %s976_s16  ;;  %p980_p10 = scmp.lt.s32.totalorder %s1203_s18, %s976_s16 }
  0x8c   : > { %p981_p11 = por %p980_p10, %p979_p9 }
  0x8e   : > { %p982_p12 = pnand %p981_p11, %p977_p8 }
  0x90   : > { %985 = shalt.err (!%p982_p12)  }
  0x91   : > { %s986_s19 = sshra.s32 %s195_s22, 4  ;;  %s987_s19 = int_to_ptr.vmem [resolvable:$true] %s986_s19 }
  0x92   : > { %s988_s0 = scalar_lea.vmem %s987_s19, 1  ;;  %p991_p0 = scmp.lt.s32.totalorder %s987_s19, [#allocation2] }
  0x93   : > { %p989_p13 = scmp.ne.s32.totalorder %s987_s19, %s988_s0  ;;  %p992_p1 = scmp.lt.s32.totalorder %s1210_s25, %s988_s0 }
  0x95   : > { %p993_p2 = por %p992_p1, %p991_p0 }
  0x97   : > { %p994_p3 = pnand %p993_p2, %p989_p13 }
  0x99   : > { %997 = shalt.err (!%p994_p3)  }
  0x9a   : > { %197 = dma.hbm_to_vmem [thread:$0]  %s193_s10, 16, %s195_s22, [#allocation3 + $0x5] }
  0x9b   : > { %s199_s27 = sld [smem:[#allocation5 + %s198_s28]]  ;;  %s605_s20 = scalar_lea.vmem %s1174_s21, 6 [#allocation2] }
  0x9c   : > { %s217_s23 = sadd.s32 7, %s1170_s5  ;;  %s213_s29 = sshll.u32 %s605_s20, 4  ;;  %s214_s29 = int_to_ptr.vmem [resolvable:$true] %s213_s29 }
  0x9d   : > { %s1302_s26 = sld [smem:[#allocation5 + %s217_s23]]  ;;  %s609_s30 = scalar_lea.vmem %s1174_s21, 7 [#allocation2] }
  0x9e   : > { %s1305_s8 = sshll.u32 %s609_s30, 4  ;;  %s233_s8 = int_to_ptr.vmem [resolvable:$true] %s1305_s8 }
  0xa1   : > { %s201_s15 = scalar_lea.hbm %s1342_s1, %s199_s27 }
  0xa2   : > { %s211_s11 = sshll.u32 %s201_s15, 4  ;;  %s212_s11 = int_to_ptr.hbm [resolvable:$true] %s211_s11 }
  0xa3   : > { %s220_s5 = scalar_lea.hbm %s1342_s1, %s1302_s26  ;;  %s998_s24 = sshra.s32 %s212_s11, 4  ;;  %s999_s24 = int_to_ptr.hbm [resolvable:$true] %s998_s24 }
  0xa4   : > { %s1000_s12 = scalar_lea.hbm %s999_s24, 1  ;;  %p1003_p5 = scmp.lt.s32.totalorder %s999_s24, %s1342_s1 }
  0xa5   : > { %p1001_p4 = scmp.ne.s32.totalorder %s999_s24, %s1000_s12  ;;  %p1004_p6 = scmp.lt.s32.totalorder %s1203_s18, %s1000_s12 }
  0xa7   : > { %p1005_p7 = por %p1004_p6, %p1003_p5 }
  0xa9   : > { %p1006_p8 = pnand %p1005_p7, %p1001_p4 }
  0xab   : > { %1009 = shalt.err (!%p1006_p8)  }
  0xac   : > { %s1010_s13 = sshra.s32 %s214_s29, 4  ;;  %s1011_s13 = int_to_ptr.vmem [resolvable:$true] %s1010_s13 }
  0xad   : > { %s1012_s16 = scalar_lea.vmem %s1011_s13, 1  ;;  %p1015_p10 = scmp.lt.s32.totalorder %s1011_s13, [#allocation2] }
  0xae   : > { %p1013_p9 = scmp.ne.s32.totalorder %s1011_s13, %s1012_s16  ;;  %p1016_p11 = scmp.lt.s32.totalorder %s1210_s25, %s1012_s16 }
  0xb0   : > { %p1017_p12 = por %p1016_p11, %p1015_p10 }
  0xb2   : > { %p1018_p13 = pnand %p1017_p12, %p1013_p9 }
  0xb4   : > { %1021 = shalt.err (!%p1018_p13)  }
  0xb5   : > { %216 = dma.hbm_to_vmem [thread:$0]  %s212_s11, 16, %s214_s29, [#allocation3 + $0x6] }
  0xb6   : > { %s230_s17 = sshll.u32 %s220_s5, 4  ;;  %s231_s17 = int_to_ptr.hbm [resolvable:$true] %s230_s17 }
  0xb7   : > { %s1022_s4 = sshra.s32 %s231_s17, 4  ;;  %s1023_s4 = int_to_ptr.hbm [resolvable:$true] %s1022_s4 }
  0xb8   : > { %s1024_s19 = scalar_lea.hbm %s1023_s4, 1  ;;  %p1027_p1 = scmp.lt.s32.totalorder %s1023_s4, %s1342_s1 }
  0xb9   : > { %p1025_p0 = scmp.ne.s32.totalorder %s1023_s4, %s1024_s19  ;;  %p1028_p2 = scmp.lt.s32.totalorder %s1203_s18, %s1024_s19 }
  0xbb   : > { %p1029_p3 = por %p1028_p2, %p1027_p1 }
  0xbd   : > { %p1030_p4 = pnand %p1029_p3, %p1025_p0 }
  0xbf   : > { %1033 = shalt.err (!%p1030_p4)  }
  0xc0   : > { %s1034_s20 = sshra.s32 %s233_s8, 4  ;;  %s1035_s20 = int_to_ptr.vmem [resolvable:$true] %s1034_s20 }
  0xc1   : > { %s1036_s23 = scalar_lea.vmem %s1035_s20, 1  ;;  %p1039_p6 = scmp.lt.s32.totalorder %s1035_s20, [#allocation2] }
  0xc2   : > { %p1037_p5 = scmp.ne.s32.totalorder %s1035_s20, %s1036_s23  ;;  %p1040_p7 = scmp.lt.s32.totalorder %s1210_s25, %s1036_s23 }
  0xc4   : > { %p1041_p8 = por %p1040_p7, %p1039_p6 }
  0xc6   : > { %p1042_p9 = pnand %p1041_p8, %p1037_p5 }
  0xc8   : > { %1045 = shalt.err (!%p1042_p9)  }
  0xc9   : > { %235 = dma.hbm_to_vmem [thread:$0]  %s231_s17, 16, %s233_s8, [#allocation3 + $0x7] }
  0xca   : > { %1080 = dma.done.wait [#allocation3], 16 }
  0xcb   : > { %1081 = vsyncadd [#allocation3], 4294967280 }
  0xcc   : > { %1082 = dma.done.wait [#allocation3 + $0x1], 16 }
  0xcd   : > { %1083 = vsyncadd [#allocation3 + $0x1], 4294967280 }
  0xce   : > { %1084 = dma.done.wait [#allocation3 + $0x2], 16 }
  0xcf   : > { %1085 = vsyncadd [#allocation3 + $0x2], 4294967280 }
  0xd0   : > { %1086 = dma.done.wait [#allocation3 + $0x3], 16 }
  0xd1   : > { %1087 = vsyncadd [#allocation3 + $0x3], 4294967280 }
  0xd2   : > { %1088 = dma.done.wait [#allocation3 + $0x4], 16 }
  0xd3   : > { %1089 = vsyncadd [#allocation3 + $0x4], 4294967280 }
  0xd4   : > { %1090 = dma.done.wait [#allocation3 + $0x5], 16 }
  0xd5   : > { %1091 = vsyncadd [#allocation3 + $0x5], 4294967280 }
  0xd6   : > { %1092 = dma.done.wait [#allocation3 + $0x6], 16 }
  0xd7   : > { %1093 = vsyncadd [#allocation3 + $0x6], 4294967280 }
  0xd8   : > { %1094 = dma.done.wait [#allocation3 + $0x7], 16 }
  0xd9   : > { %1095 = vsyncadd [#allocation3 + $0x7], 4294967280  ;;  %s84_s2 = sadd.s32 1, %s1100_s2  }
  0xda   : > { %p81_p10 = scmp.ge.s32.totalorder %s84_s2, 2  }
  0xdb   :  { %v734_v0 = vld [vmem:[#allocation6 + $0x38] sm:$0xff] (%p81_p10)  ;;  %v733_v1 = vld [vmem:[#allocation6 + $0x30] sm:$0xff] (%p81_p10)  ;;  %v732_v5 = vld [vmem:[#allocation6 + $0x28] sm:$0xff] (%p81_p10)  ;;  %s1109_s26 = smov (%p81_p10), [#allocation12]   ;;  %s510_s8 = sshll.u32 (%p81_p10), %s1348_s7, 4  ;;  %s511_s8 = int_to_ptr.hbm [resolvable:$true] %s510_s8 }
  0xdc   :  { %83 = sbr.rel (!%p81_p10) target bundleno = 21 (0x15), region = 121  ;;  %323 = vmatpush.bf16.msra.mxu0 (%p81_p10), %v734_v0  ;;  %v742_v2 = vld [vmem:[#allocation9 + $0x38] sm:$0xff] (%p81_p10)  ;;  %v741_v4 = vld [vmem:[#allocation9 + $0x30] sm:$0xff] (%p81_p10)  ;;  %v740_v7 = vld [vmem:[#allocation9 + $0x28] sm:$0xff] (%p81_p10)  ;;  %s1110_s9 = smov (%p81_p10), 128  }
  0xdd   :  { %v750_v3 = vld [vmem:[#allocation11 + $0x38] sm:$0xff] (%p81_p10)  ;;  %480 = vmatpush.bf16.msra.mxu2 (%p81_p10), %v742_v2  ;;  %v749_v6 = vld [vmem:[#allocation11 + $0x30] sm:$0xff] (%p81_p10)  ;;  %v731_v8 = vld [vmem:[#allocation6 + $0x20] sm:$0xff] (%p81_p10)  ;;  %s1111_s14 = smov (%p81_p10), 8  }
  0xde   :  { %418 = vmatpush.bf16.msra.mxu1 (%p81_p10), %v750_v3  ;;  %v748_v9 = vld [vmem:[#allocation11 + $0x28] sm:$0xff] (%p81_p10)  ;;  %v739_v10 = vld [vmem:[#allocation9 + $0x20] sm:$0xff] (%p81_p10)  ;;  %v730_v11 = vld [vmem:[#allocation6 + $0x18] sm:$0xff] (%p81_p10) }
  0xdf   :  { %v747_v12 = vld [vmem:[#allocation11 + $0x20] sm:$0xff] (%p81_p10)  ;;  %v738_v13 = vld [vmem:[#allocation9 + $0x18] sm:$0xff] (%p81_p10)  ;;  %v729_v14 = vld [vmem:[#allocation6 + $0x10] sm:$0xff] (%p81_p10) }
  0xe0   :  { %324 = vmatpush.bf16.msra.mxu0 (%p81_p10), %v733_v1  ;;  %v746_v15 = vld [vmem:[#allocation11 + $0x18] sm:$0xff] (%p81_p10)  ;;  %v737_v16 = vld [vmem:[#allocation9 + $0x10] sm:$0xff] (%p81_p10)  ;;  %v728_v17 = vld [vmem:[#allocation6 + $0x8] sm:$0xff] (%p81_p10) }
  0xe1   :  { %481 = vmatpush.bf16.msra.mxu2 %v741_v4  ;;  %v736_v18 = vld [vmem:[#allocation9 + $0x8] sm:$0xff]  ;;  %v727_v19 = vld [vmem:[#allocation6] sm:$0xff]  ;;  %v252_v20 = vld [vmem:[#allocation2] sm:$0xff] }
  0xe2   :  { %419 = vmatpush.bf16.msra.mxu1 %v749_v6  ;;  %v253_v21 = vld [vmem:[#allocation2 + $0x8] sm:$0xff]  ;;  %v735_v23 = vld [vmem:[#allocation9] sm:$0xff]  ;;  %v745_v24 = vld [vmem:[#allocation11 + $0x10] sm:$0xff] }
  0xe3   :  { %v254_v22 = vpack.c.bf16 %v253_v21, %v252_v20  ;;  %v744_v25 = vld [vmem:[#allocation11 + $0x8] sm:$0xff]  ;;  %v743_v26 = vld [vmem:[#allocation11] sm:$0xff]  ;;  %v768_v28 = vld [vmem:[%s1344_s3] ss:$0 sm:$0xff]  ;;  %s508_s3 = sshll.u32 %s1109_s26, 4  ;;  %s509_s3 = int_to_ptr.vmem [resolvable:$true] %s508_s3 }
  0xe4   :  { %325 = vmatpush.bf16.msra.mxu0 %v732_v5  ;;  %v769_v36 = vld [vmem:[%s1347_s6] ss:$0 sm:$0xff] }
  0xe5   :  { %482 = vmatpush.bf16.msra.mxu2 %v740_v7 }
  0xe6   :  { %420 = vmatpush.bf16.msra.mxu1 %v748_v9 }
  0xe8   :  { %326 = vmatpush.bf16.msra.mxu0 %v731_v8 }
  0xe9   :  { %483 = vmatpush.bf16.msra.mxu2 %v739_v10 }
  0xea   :  { %421 = vmatpush.bf16.msra.mxu1 %v747_v12 }
  0xec   :  { %327 = vmatpush.bf16.msra.mxu0 %v730_v11 }
  0xed   :  { %484 = vmatpush.bf16.msra.mxu2 %v738_v13 }
  0xee   :  { %422 = vmatpush.bf16.msra.mxu1 %v746_v15 }
  0xf0   :  { %328 = vmatpush.bf16.msra.mxu0 %v729_v14 }
  0xf1   :  { %485 = vmatpush.bf16.msra.mxu2 %v737_v16 }
  0xf2   :  { %423 = vmatpush.bf16.msra.mxu1 %v745_v24 }
  0xf4   :  { %329 = vmatpush.bf16.msra.mxu0 %v728_v17 }
  0xf5   :  { %486 = vmatpush.bf16.msra.mxu2 %v736_v18 }
  0xf6   :  { %424 = vmatpush.bf16.msra.mxu1 %v744_v25 }
  0xf8   :  { %330 = vmatpush.bf16.msra.mxu0 %v727_v19 }
  0xf9   :  { %487 = vmatpush.bf16.msra.mxu2 %v735_v23 }
  0xfa   :  { %425 = vmatpush.bf16.msra.mxu1 %v743_v26 }
  0xfb   :  { %331 = vmatmul.bf16.vlgmr.msra.gmra.mxu0 %v254_v22 }
  0xfc   :  { %488 = vmatmul.bf16.vlgmr.msra.gmra.mxu2 %v254_v22 }
 0x178   :  { %v332_v27 = vpop.f32.mrf.mxu0 }
 0x179   :  { %v333_v30 = vadd.f32 %v768_v28, %v332_v27 }
 0x17f   :  { %v489_v33 = vpop.f32.mrf.mxu2 }
 0x180   :  { %v334_v29 = vpop.f32.mrf.mxu0 }
 0x181   :  { %v335_v31 = vadd.f32 %v768_v28, %v334_v29 }
 0x183   :  { %v353_v32 = vpack.c.bf16 %v335_v31, %v333_v30 }
 0x185   :  { %426 = vmatmul.bf16.vlgmr.msra.gmra.mxu1 %v353_v32 }
 0x187   :  { %v491_v39 = vpop.f32.mrf.mxu2 }
 0x202   :  { %v427_v34 = vpop.f32.mrf.mxu1 }
 0x203   :  { %v490_v35 = vadd.f32 %v489_v33, %v427_v34 }
 0x205   :  { %v494_v37 = vmul.f32 0.5, %v490_v35 }
 0x207   :  { %v500_v38 = vadd.f32 %v769_v36, %v494_v37 }
 0x209   :  { %502 = vst [vmem:[#allocation12] sm:$0xff] %v500_v38 }
 0x20a   :  { %v429_v40 = vpop.f32.mrf.mxu1 }
 0x20b   :  { %v492_v41 = vadd.f32 %v491_v39, %v429_v40 }
 0x20d   :  { %v495_v42 = vmul.f32 0.5, %v492_v41 }
 0x20f   :  { %v501_v43 = vadd.f32 %v769_v36, %v495_v42 }
 0x211   :  { %503 = vst [vmem:[#allocation12 + $0x8] sm:$0xff] %v501_v43 }
 0x212   :  { %516 = dma.vmem_to_hbm [thread:$0]  %s509_s3, 256, %s511_s8, [#allocation8], %s1110_s9, %s1110_s9, %s1111_s14  }
 0x213   :  { %1096 = dma.done.wait [#allocation8], 256  }
 0x214   :  { %1097 = vsyncadd [#allocation8], 4294967040 }
 0x215   :  { %521 = vsyncpa [#allocation7], 1 }
 0x216   :  { %522 = vsyncpa [#allocation10], 1 }
 0x217   :  { %523 = vsyncpa [#allocation8], 1 }
 0x218   :  { %524 = vsyncmov [#allocation3] }
 0x21b   :  { %s525_s6 = vpop.sfrf %524 }
 0x21c   :  { %p719_p11 = scmp.ne.s32.totalorder %s525_s6, 0 }
 0x21e   :  { %529 = shalt.err (%p719_p11)  }
 0x21f   :  { %531 = vsyncmov [#allocation3 + $0x1] }
 0x222   :  { %s532_s15 = vpop.sfrf %531 }
 0x223   :  { %p720_p12 = scmp.ne.s32.totalorder %s532_s15, 0 }
 0x225   :  { %536 = shalt.err (%p720_p12)  }
 0x226   :  { %538 = vsyncmov [#allocation3 + $0x2] }
 0x229   :  { %s539_s7 = vpop.sfrf %538 }
 0x22a   :  { %p721_p13 = scmp.ne.s32.totalorder %s539_s7, 0 }
 0x22c   :  { %543 = shalt.err (%p721_p13)  }
 0x22d   :  { %545 = vsyncmov [#allocation3 + $0x3] }
 0x230   :  { %s546_s11 = vpop.sfrf %545 }
 0x231   :  { %p722_p0 = scmp.ne.s32.totalorder %s546_s11, 0 }
 0x233   :  { %550 = shalt.err (%p722_p0)  }
 0x234   :  { %552 = vsyncmov [#allocation3 + $0x4] }
 0x237   :  { %s553_s22 = vpop.sfrf %552 }
 0x238   :  { %p723_p1 = scmp.ne.s32.totalorder %s553_s22, 0 }
 0x23a   :  { %557 = shalt.err (%p723_p1)  }
 0x23b   :  { %559 = vsyncmov [#allocation3 + $0x5] }
 0x23e   :  { %s560_s10 = vpop.sfrf %559 }
 0x23f   :  { %p724_p2 = scmp.ne.s32.totalorder %s560_s10, 0 }
 0x241   :  { %564 = shalt.err (%p724_p2)  }
 0x242   :  { %566 = vsyncmov [#allocation3 + $0x6] }
 0x245   :  { %s567_s5 = vpop.sfrf %566 }
 0x246   :  { %p725_p3 = scmp.ne.s32.totalorder %s567_s5, 0 }
 0x248   :  { %571 = shalt.err (%p725_p3)  }
 0x249   :  { %573 = vsyncmov [#allocation3 + $0x7] }
 0x24c   :  { %s574_s24 = vpop.sfrf %573 }
 0x24d   :  { %p726_p4 = scmp.ne.s32.totalorder %s574_s24, 0 }
 0x24f   :  { %578 = shalt.err (%p726_p4)  }

</bundles_post_ra>
